<compile_context>
chip_gen: v7x
topology: tpu7x:2x2x1
jax: 0.10.0
libtpu: 0.0.40
codegen_flags: <defaults>
</compile_context>

<pallas_src>
import functools
import math

import jax
import jax.numpy as jnp
from jax.experimental import pallas as pl
from jax.experimental.pallas import tpu as pltpu

# ---- toy hyperparameters (small shapes consistent with the module) ----
BATCH = 2                      # independent sequences -> parallel grid axis
SEQ = 16
DIM = 128
N_HEADS = 4
HEAD_DIM = DIM // N_HEADS
HIDDEN = DIM                   # FeedForward(hidden_dim=dim, multiple_of=1)
NORM_EPS = 1e-5                # args.norm_eps used inside the block
RMS_EPS = 1e-6                 # RMSNorm module default eps


def _rmsnorm_math(x_f32, w_row, eps):
    """x * rsqrt(mean(x^2, -1) + eps) * w, all f32. w_row is (1, D)."""
    ms = jnp.mean(x_f32 * x_f32, axis=-1, keepdims=True)
    return x_f32 * jax.lax.rsqrt(ms + eps) * w_row


# =============================================================================
# 1) RMSNorm — the spec module as a standalone Pallas kernel.
# =============================================================================
def rmsnorm_kernel(x_ref, w_ref, o_ref, *, eps):
    x = x_ref[...].astype(jnp.float32)                          # x.float()
    ms = jnp.mean(x * x, axis=-1, keepdims=True)
    xn = (x * jax.lax.rsqrt(ms + eps)).astype(x_ref.dtype)      # .type_as(x)
    o_ref[...] = (xn * w_ref[...]).astype(o_ref.dtype)          # * self.weight


def rmsnorm(x, weight, *, eps=RMS_EPS, row_tile=16):
    """RMSNorm over the last dim. x: (..., D), weight: (D,)."""
    orig_shape = x.shape
    d = orig_shape[-1]
    x2 = x.reshape(-1, d)
    rows = x2.shape[0]
    assert rows % row_tile == 0, "toy wrapper assumes row count divisible by tile"
    w2 = weight.reshape(1, d)                                   # 2-D for vreg layout

    out = pl.pallas_call(
        functools.partial(rmsnorm_kernel, eps=eps),
        out_shape=jax.ShapeDtypeStruct((rows, d), x.dtype),
        grid=(rows // row_tile,),
        in_specs=[
            pl.BlockSpec((row_tile, d), lambda i: (i, 0)),      # lane-dense row tiles
            pl.BlockSpec((1, d), lambda i: (0, 0)),             # weight stays resident
        ],
        out_specs=pl.BlockSpec((row_tile, d), lambda i: (i, 0)),
        compiler_params=pltpu.CompilerParams(
            dimension_semantics=("parallel",)),                 # both TCs on v7x
    )(x2, w2)
    return out.reshape(orig_shape)


# =============================================================================
# 2) Fused TransformerBlock forward (the alibi.py context using RMSNorm).
# =============================================================================
# TODO(synk): the Attention KV-cache in-place update / start_pos>0 incremental decode
# path is stateful (torch buffers); only the start_pos=0 full-sequence path is modeled.
def transformer_block_kernel(x_ref, anw_ref, wqkv_ref, wo_ref, fnw_ref,
                             w13_ref, w2_ref, o_ref):
    _, S, D = x_ref.shape
    H, _, E = wqkv_ref.shape
    Hd = E // 3
    hidden = w13_ref.shape[1] // 2
    scale = 1.0 / math.sqrt(Hd)

    x = x_ref[0, :, :].astype(jnp.float32)                      # (S, D)

    # ---- attention RMSNorm (f32) ----
    xn = _rmsnorm_math(x, anw_ref[...], NORM_EPS)

    # ---- fused, head-batched QKV projection: single bf16 batched matmul ----
    xnb = jnp.broadcast_to(xn.astype(jnp.bfloat16)[None], (H, S, D))      # (H,S,D)
    qkv = jnp.einsum("hsd,hde->hse", xnb, wqkv_ref[...],
                     preferred_element_type=jnp.float32)                  # (H,S,3*Hd)
    q = qkv[..., :Hd]
    k = qkv[..., Hd:2 * Hd]
    v = qkv[..., 2 * Hd:]

    # ---- scores, heads batched on the leading (major) dim: no .T, no per-head loop ----
    s = jnp.einsum("hqd,hkd->hqk",
                   q.astype(jnp.bfloat16), k.astype(jnp.bfloat16),
                   preferred_element_type=jnp.float32) * scale            # (H,S,S)

    # causal mask generated in-kernel (cheap VPU compare/select, no HBM input)
    row_id = jax.lax.broadcasted_iota(jnp.int32, (S, S), 0)
    col_id = jax.lax.broadcasted_iota(jnp.int32, (S, S), 1)
    mask = jnp.where(col_id <= row_id, jnp.float32(0.0), jnp.float32(-1e30))
    s = s + mask[None]

    # ---- softmax in f32; approx reciprocal goes to the otherwise-idle EUP ----
    m = jnp.max(s, axis=-1, keepdims=True)
    p = jnp.exp(s - m)
    l = jnp.sum(p, axis=-1, keepdims=True)
    p = p * pl.reciprocal(l, approx=True)

    attn = jnp.einsum("hqk,hkd->hqd",
                      p.astype(jnp.bfloat16), v.astype(jnp.bfloat16),
                      preferred_element_type=jnp.float32)                 # (H,S,Hd)

    # ---- output projection, still head-batched; merging heads = summing per-head
    #      contributions (mathematically == concat(heads) @ wo, no lane concat) ----
    o_h = jnp.einsum("hsk,hkd->hsd",
                     attn.astype(jnp.bfloat16), wo_ref[...],
                     preferred_element_type=jnp.float32)                  # (H,S,D)
    attn_out = o_h[0]
    for h in range(1, H):            # H=4 static VPU adds; no cross-lane movement
        attn_out = attn_out + o_h[h]

    h1 = x + attn_out                                                     # residual, f32

    # ---- ffn RMSNorm + SwiGLU with fused w1|w3 (one wide N=2*hidden matmul) ----
    hn = _rmsnorm_math(h1, fnw_ref[...], NORM_EPS)
    gu = jnp.dot(hn.astype(jnp.bfloat16), w13_ref[...],
                 preferred_element_type=jnp.float32)                      # (S, 2*hidden)
    g = gu[:, :hidden]
    u = gu[:, hidden:]
    ff_in = (g * jax.nn.sigmoid(g)) * u                                   # F.silu(g)*u, f32
    ff = jnp.dot(ff_in.astype(jnp.bfloat16), w2_ref[...],
                 preferred_element_type=jnp.float32)                      # (S, D)

    o_ref[0, :, :] = (h1 + ff).astype(o_ref.dtype)


def transformer_block(x, params):
    """x: (B, S, D) f32 — B independent sequences (start_pos=0, fresh cache)."""
    B, S, D = x.shape
    H, Hd = N_HEADS, HEAD_DIM

    # --- wrapper-side weight packing (plain XLA, not inside the kernel) ---
    def per_head(w):                           # (D, H*Hd) -> (H, D, Hd)
        return w.reshape(D, H, Hd).transpose(1, 0, 2)

    wqkv_h = jnp.concatenate(
        [per_head(params["wq"]), per_head(params["wk"]), per_head(params["wv"])],
        axis=-1).astype(jnp.bfloat16)                                     # (H, D, 3*Hd)
    wo_h = params["wo"].reshape(H, Hd, D).astype(jnp.bfloat16)            # (H, Hd, D)
    w13 = jnp.concatenate([params["w1"], params["w3"]], axis=1).astype(jnp.bfloat16)
    w2 = params["w2"].astype(jnp.bfloat16)
    anw = params["attn_norm_w"]                # (1, D) f32 (norms stay f32)
    fnw = params["ffn_norm_w"]                 # (1, D) f32

    seq_spec = pl.BlockSpec((1, S, D), lambda b: (b, 0, 0))

    def resident(a):                           # whole weight, same block every grid step
        nd = a.ndim
        def idx(b):
            return (0,) * nd
        return pl.BlockSpec(a.shape, idx)

    return pl.pallas_call(
        transformer_block_kernel,
        out_shape=jax.ShapeDtypeStruct((B, S, D), x.dtype),
        grid=(B,),
        in_specs=[seq_spec, resident(anw), resident(wqkv_h), resident(wo_h),
                  resident(fnw), resident(w13), resident(w2)],
        out_specs=seq_spec,
        compiler_params=pltpu.CompilerParams(
            dimension_semantics=("parallel",)),        # batch axis -> both v7x TCs
    )(x, anw, wqkv_h, wo_h, fnw, w13, w2)


# =============================================================================
# init + pure-JAX references
# =============================================================================
def init_params(key):
    ks = jax.random.split(key, 9)
    scale = 0.02

    def lin(k, din, dout):
        # PyTorch Linear weight is (dout, din); we store its transpose so y = x @ W.
        return (scale * jax.random.normal(k, (din, dout))).astype(jnp.float32)

    return {
        "attn_norm_w": (1.0 + 0.05 * jax.random.normal(ks[7], (1, DIM))).astype(jnp.float32),
        "wq": lin(ks[0], DIM, DIM),
        "wk": lin(ks[1], DIM, DIM),
        "wv": lin(ks[2], DIM, DIM),
        "wo": lin(ks[3], DIM, DIM),
        "ffn_norm_w": (1.0 + 0.05 * jax.random.normal(ks[8], (1, DIM))).astype(jnp.float32),
        "w1": lin(ks[4], DIM, HIDDEN),
        "w2": lin(ks[5], HIDDEN, DIM),
        "w3": lin(ks[6], DIM, HIDDEN),
    }


def reference_block(x, p):
    """Pure-JAX f32 reference mirroring the PyTorch forward (start_pos=0)."""
    rows = jnp.arange(SEQ)[:, None]
    cols = jnp.arange(SEQ)[None, :]
    mask = jnp.where(cols <= rows, 0.0, -1e30).astype(jnp.float32)

    def rms(v, w, eps):
        return v * jax.lax.rsqrt(jnp.mean(v * v, -1, keepdims=True) + eps) * w

    def one(xs):
        xn = rms(xs, p["attn_norm_w"], NORM_EPS)
        q = (xn @ p["wq"]).reshape(SEQ, N_HEADS, HEAD_DIM).transpose(1, 0, 2)
        k = (xn @ p["wk"]).reshape(SEQ, N_HEADS, HEAD_DIM).transpose(1, 0, 2)
        v = (xn @ p["wv"]).reshape(SEQ, N_HEADS, HEAD_DIM).transpose(1, 0, 2)
        s = jnp.einsum("hqd,hkd->hqk", q, k) / math.sqrt(HEAD_DIM) + mask[None]
        a = jax.nn.softmax(s, axis=-1)
        o = jnp.einsum("hqk,hkd->hqd", a, v).transpose(1, 0, 2).reshape(SEQ, DIM)
        h1 = xs + o @ p["wo"]
        hn = rms(h1, p["ffn_norm_w"], NORM_EPS)
        g = hn @ p["w1"]
        return h1 + ((g * jax.nn.sigmoid(g)) * (hn @ p["w3"])) @ p["w2"]

    return jax.vmap(one)(x)


if __name__ == "__main__":
    key = jax.random.PRNGKey(0)
    kx, kp, kw = jax.random.split(key, 3)

    x = jax.random.normal(kx, (BATCH, SEQ, DIM), dtype=jnp.float32)

    # ---- 1) RMSNorm kernel (the spec module), exact f32 check ----
    rms_w = (1.0 + 0.1 * jax.random.normal(kw, (DIM,))).astype(jnp.float32)
    y = jax.block_until_ready(rmsnorm(x, rms_w, eps=RMS_EPS))
    y_ref = (x * jax.lax.rsqrt(jnp.mean(x * x, -1, keepdims=True) + RMS_EPS)) * rms_w
    assert y.shape == x.shape
    assert jnp.allclose(y, y_ref, atol=1e-5, rtol=1e-5), "RMSNorm mismatch"

    # ---- 2) fused TransformerBlock kernel (RMSNorm in its alibi.py context) ----
    params = init_params(kp)
    out = jax.block_until_ready(transformer_block(x, params))
    ref = reference_block(x, params)
    assert out.shape == (BATCH, SEQ, DIM)
    # bf16 MXU operands (f32 accumulation) vs an all-f32 reference -> modest tolerance
    assert jnp.allclose(out, ref, atol=2e-2, rtol=2e-2), "block mismatch vs reference"

    print("KERNEL_OK")
</pallas_src>

<mosaic_0001>
module attributes {stable_mosaic.version = 11 : i64} {
  func.func @rmsnorm_kernel(%arg0: i32, %arg1: memref<16x128xf32, #tpu.memory_space<vmem>>, %arg2: memref<1x128xf32, #tpu.memory_space<vmem>>, %arg3: memref<16x128xf32, #tpu.memory_space<vmem>>) attributes {dimension_semantics = [#tpu.dimension_semantics<parallel>], iteration_bounds = array<i64: 2>, scalar_prefetch = 0 : i64, scratch_operands = 0 : i64, tpu.core_type = #tpu.core_type<tc>, window_params = [{transform_indices = @transform_0, window_bounds = array<i64: 16, 128>}, {pipeline_mode = #tpu.pipeline_mode<synchronous>, transform_indices = @transform_1, window_bounds = array<i64: 1, 128>}, {transform_indices = @transform_2, window_bounds = array<i64: 16, 128>}]} {
    %c0 = arith.constant 0 : index
    %c0_0 = arith.constant 0 : index
    %0 = vector.load %arg1[%c0, %c0_0] : memref<16x128xf32, #tpu.memory_space<vmem>>, vector<16x128xf32>
    %1 = arith.mulf %0, %0 : vector<16x128xf32>
    %cst = arith.constant dense<0.000000e+00> : vector<16xf32>
    %2 = vector.multi_reduction <add>, %1, %cst [1] : vector<16x128xf32> to vector<16xf32>
    %3 = vector.shape_cast %2 : vector<16xf32> to vector<16x1xf32>
    %cst_1 = arith.constant 1.280000e+02 : f32
    %4 = vector.broadcast %cst_1 : f32 to vector<16x1xf32>
    %5 = arith.divf %3, %4 : vector<16x1xf32>
    %cst_2 = arith.constant 9.99999997E-7 : f32
    %6 = vector.broadcast %cst_2 : f32 to vector<16x1xf32>
    %7 = arith.addf %5, %6 : vector<16x1xf32>
    %8 = math.rsqrt %7 : vector<16x1xf32>
    %9 = vector.broadcast %8 : vector<16x1xf32> to vector<16x128xf32>
    %10 = arith.mulf %0, %9 : vector<16x128xf32>
    %c0_3 = arith.constant 0 : index
    %c0_4 = arith.constant 0 : index
    %11 = vector.load %arg2[%c0_3, %c0_4] : memref<1x128xf32, #tpu.memory_space<vmem>>, vector<1x128xf32>
    %12 = vector.broadcast %11 : vector<1x128xf32> to vector<16x128xf32>
    %13 = arith.mulf %10, %12 : vector<16x128xf32>
    %c0_5 = arith.constant 0 : index
    %c0_6 = arith.constant 0 : index
    %14 = vector.load %arg3[%c0_5, %c0_6] : memref<16x128xf32, #tpu.memory_space<vmem>>, vector<16x128xf32>
    tpu.vector_store %arg3[%c0_5, %c0_6], %13 {strides = array<i32>} : memref<16x128xf32, #tpu.memory_space<vmem>>, vector<16x128xf32>,
    return
  }
  func.func @transform_0(%arg0: i32) -> (i32, i32) {
    %c0_i32 = arith.constant 0 : i32
    %c0_i32_0 = arith.constant 0 : i32
    return %arg0, %c0_i32 : i32, i32
  }
  func.func @transform_1(%arg0: i32) -> (i32, i32) {
    %c0_i32 = arith.constant 0 : i32
    %c0_i32_0 = arith.constant 0 : i32
    %c0_i32_1 = arith.constant 0 : i32
    return %c0_i32, %c0_i32_0 : i32, i32
  }
  func.func @transform_2(%arg0: i32) -> (i32, i32) {
    %c0_i32 = arith.constant 0 : i32
    %c0_i32_0 = arith.constant 0 : i32
    return %arg0, %c0_i32 : i32, i32
  }
}

</mosaic_0001>

<bundles_post_ra>
// kernel: tpu_custom_call.1
= control target key start
LH: loop header
LB: loop body
LE: loop exit
PB: predicated region body
PF: predicated region fallthrough
CT: control target
= control target key end

     0   :  { %7 = vsyncpa [#allocation3], 0  ;;  %s634_s0 = inlined_call_operand.hbm [shape: f32[32,128], index: 0, kind: input, shape index: {}]   ;;  %s635_s1 = inlined_call_operand.vmem [shape: f32[1,128], index: 1, kind: input, shape index: {}]   ;;  %s636_s2 = inlined_call_operand.hbm [shape: f32[32,128], index: 2, kind: output, shape index: {}]  }
   0x1   :  { %9 = vsyncpa [#allocation3 + $0x1], 0 }
   0x2   :  { %10 = vsyncpa [#allocation4], 0 }
   0x3   :  { %12 = vsyncpa [#allocation4 + $0x1], 0  ;;  %s469_s9 = smov 0   ;;  %s471_s10 = smov 0  }
   0x4   :  { %s473_s11 = smov 0   ;;  %s475_s12 = smov 0  }
   0x5 LB: > { %s490_s13 = sadd.s32 4294967295, %s446_s12   ;;  %s279_s14 = sadd.s32 4294967294, %s446_s12   ;;  %s446_s12 = sphi %s475_s12, %s649_s12   ;;  %s442_s11 = sphi %s473_s11, %s648_s11   ;;  %s438_s10 = sphi %s471_s10, %s647_s10   ;;  %s434_s9 = sphi %s469_s9, %s646_s9  }
   0x6   : > { %s494_s15 = sadd.s32 1, %s446_s12   ;;  %s25_s16 = sadd.s32 1, %s442_s11 }
   0x7   : > { %s22_s17 = ssub.s32 %s446_s12, %s494_s15  ;;  %p32_p0 = scmp.ne.s32.totalorder %s442_s11, %s438_s10 }
   0x8   : > { %p23_p1 = scmp.eq.s32.totalorder %s22_s17, 0  ;;  %p33_p2 = scmp.eq.s32.totalorder %s446_s12, 0 }
   0x9   : > { %p38_p3 = scmp.ne.s32.totalorder %s438_s10, %s434_s9  ;;  %p39_p4 = scmp.eq.s32.totalorder %s490_s13, 0 }
   0xa   : > { %s506_s18 = scalar_select %p23_p1, %s442_s11, %s25_s16  }
   0xb   : > { %p508_p5 = por %p33_p2, %p32_p0  ;;  %p512_p6 = por %p39_p4, %p38_p3 }
   0xc   : > { %p83_p7 = scmp.eq.s32.totalorder %s490_s13, 1  ;;  %p89_p8 = scmp.eq.s32.totalorder %s279_s14, 1 }
   0xd   : > { %p308_p10 = scmp.lt.s32.totalorder %s446_s12, 2  ;;  %s112_s23 = sand.u32 1, %s442_s11  }
   0xe   : > { %p519_p11 = por %p83_p7, %p32_p0  ;;  %p523_p12 = por %p89_p8, %p38_p3 }
   0xf   : > { %s294_s24 = sshll.u32 %s446_s12, 8  ;;  %s282_s25 = sshll.u32 %s112_s23, 4 }
  0x10   : > { %s640_s21 = scalar_select %p519_p11, 1, 0 }
  0x11   : > { %s641_s22 = scalar_select %p523_p12, 1, 0 }
  0x12   : > { %s532_s28 = scalar_lea.hbm %s634_s0, %s294_s24  ;;  %s116_s29 = scalar_lea.vmem [#allocation2], %s282_s25 }
  0x13   : > { %s123_s30 = sshll.u32 %s116_s29, 4  ;;  %p536_p13 = pnand %p308_p10, %p508_p5  ;;  %s540_s30 = int_to_ptr.vmem [resolvable:$true] %s123_s30 }
  0x14   : > { %s542_s4 = scalar_lea.sflag [#allocation3], %s112_s23  ;;  %s350_s5 = scalar_lea.hbm %s532_s28, 256 }
  0x15   : > { %p351_p0 = scmp.ne.s32.totalorder %s532_s28, %s350_s5  ;;  %p352_p1 = pneg %p536_p13 }
  0x16   : > { %s355_s8 = scalar_lea.hbm %s634_s0, 512  ;;  %p356_p4 = scmp.lt.u32.totalorder %s532_s28, %s634_s0 }
  0x17   : > { %p353_p2 = pnand %p352_p1, %p351_p0  ;;  %p357_p5 = scmp.lt.u32.totalorder %s355_s8, %s350_s5 }
  0x18   : > { %p359_p8 = scmp.lt.u32.totalorder %s350_s5, %s532_s28 }
  0x19   : > { %p354_p3 = pneg %p353_p2  ;;  %p358_p7 = por %p357_p5, %p356_p4 }
  0x1b   : > { %p360_p10 = por %p359_p8, %p358_p7 }
  0x1d   : > { %p361_p9 = pnand %p360_p10, %p354_p3 }
  0x1f   : > { %364 = shalt.err (!%p361_p9)
}
  0x20   : > { %s365_s17 = scalar_lea.vmem %s540_s30, 256  ;;  %s448_s19 = smov [#allocation2]  }
  0x21   : > { %p366_p0 = scmp.ne.s32.totalorder %s540_s30, %s365_s17  ;;  %s370_s23 = sshll.u32 %s448_s19, 4  ;;  %s371_s23 = int_to_ptr.vmem [resolvable:$false] %s370_s23 }
  0x22   : > { %s372_s24 = scalar_lea.vmem %s371_s23, 512  ;;  %p373_p11 = scmp.lt.s32.totalorder %s540_s30, %s371_s23 }
  0x23   : > { %p368_p2 = pnand %p366_p0, %p352_p1  ;;  %p374_p4 = scmp.lt.s32.totalorder %s372_s24, %s365_s17 }
  0x25   : > { %p369_p12 = pneg %p368_p2  ;;  %p375_p5 = por %p374_p4, %p373_p11 }
  0x27   : > { %p376_p7 = pnand %p375_p5, %p369_p12 }
  0x29   : > { %379 = shalt.err (!%p376_p7)
}
  0x2a   : > { %s449_s25 = smov 128   ;;  %s450_s26 = smov 8  }
  0x2b   : > { %303 = dma.hbm_to_vmem [thread:$0]  (!%p536_p13), %s532_s28, 256, %s540_s30, %s542_s4, %s449_s25, %s449_s25, %s450_s26  }
  0x2c   : > { %p285_p9 = scmp.ge.s32.totalorder %s446_s12, 1  ;;  %p131_p1 = scmp.lt.s32.totalorder %s446_s12, 3 }
  0x2e   : > { %p132_p3 = pnand %p285_p9, %p131_p1 }
  0x2f   : > { %s573_s27 = sand.u32 (!%p132_p3), 1, %s438_s10  }
  0x30   : > { %135 = sbr.rel (%p132_p3) target bundleno = 239 (0xef), region = 28  ;;  %s286_s29 = sshll.u32 (!%p132_p3), %s573_s27, 4 }
  0x31   : > { %s138_s5 = scalar_lea.sflag (!%p132_p3), [#allocation3], %s573_s27  ;;  %s141_s6 = scalar_lea.vmem (!%p132_p3), [#allocation2], %s286_s29 }
  0x37   : > { %425 = dma.done.wait (%p512_p6), %s138_s5, 256  }
  0x38   : > { %427 = vsyncadd (%p512_p6), %s138_s5, 4294967040  ;;  %v164_v0 = vld [vmem:[%s141_s6] sm:$0xff]  ;;  %v165_v1 = vld [vmem:[%s141_s6 + $0x8] sm:$0xff]  ;;  %s295_s30 = sshll.u32 %s490_s13, 8  ;;  %s161_s3 = scalar_lea.vmem [#allocation5], %s286_s29 }
  0x39   : > { %v166_v2 = vmul.f32 %v164_v0, %v164_v0  ;;  %v167_v3 = vmul.f32 %v165_v1, %v165_v1  ;;  %v288_v11 = vld [vmem:[%s635_s1] ss:$0 sm:$0xff]  ;;  %s206_s4 = sshll.u32 %s161_s3, 4  ;;  %s588_s14 = scalar_lea.hbm %s636_s2, %s295_s30  ;;  %s590_s4 = int_to_ptr.vmem [resolvable:$true] %s206_s4 }
  0x3a   : > { %s193_s16 = scalar_lea.sflag [#allocation4], %s573_s27  ;;  %s380_s17 = scalar_lea.vmem %s590_s4, 256 }
  0x3b   : > { %168 = vadd.xlane.f32.xlu0 %v166_v2  ;;  %p381_p6 = scmp.ne.s32.totalorder %s590_s4, %s380_s17  ;;  %p643_p11 = scmp.ne.s32.totalorder %s640_s21, 0 }
  0x3c   : > { %s451_s13 = smov [#allocation5]  }
  0x3d   : > { %p382_p12 = pnand %p381_p6, %p643_p11  ;;  %s384_s19 = sshll.u32 %s451_s13, 4  ;;  %s385_s19 = int_to_ptr.vmem [resolvable:$false] %s384_s19 }
  0x3e   : > { %s386_s23 = scalar_lea.vmem %s385_s19, 512  ;;  %p387_p8 = scmp.lt.s32.totalorder %s590_s4, %s385_s19 }
  0x3f   : > { %170 = vadd.xlane.f32.xlu0 %v167_v3  ;;  %p383_p13 = pneg %p382_p12  ;;  %p388_p10 = scmp.lt.s32.totalorder %s386_s23, %s380_s17 }
  0x41   : > { %p389_p0 = por %p388_p10, %p387_p8 }
  0x43   : > { %p390_p2 = pnand %p389_p0, %p383_p13 }
  0xc8   : > { %v169_v4 = vpop.xlane.xlu0 %168 }
  0xc9   : > { %v173_v5 = vmul.f32 0.0078125, %v169_v4 }
  0xcb   : > { %v175_v6 = vadd.f32 1e-06, %v173_v5 }
  0xcc   : > { %v171_v7 = vpop.xlane.xlu0 %170 }
  0xcd   : > { %346 = vrsqrt.f32 %v175_v6  ;;  %v174_v8 = vmul.f32 0.0078125, %v171_v7 }
  0xcf   : > { %v176_v9 = vadd.f32 1e-06, %v174_v8 }
  0xd1   : > { %348 = vrsqrt.f32 %v176_v9 }
  0xd7   : > { %v347_v10 = vpop.eup %346 }
  0xd8   : > { %v179_v12 = vmul.f32 %v347_v10, %v164_v0 }
  0xda   : > { %v188_v13 = vmul.f32 %v288_v11, %v179_v12 }
  0xdb   : > { %v349_v14 = vpop.eup %348 }
  0xdc   : > { %v180_v15 = vmul.f32 %v349_v14, %v165_v1  ;;  %190 = vst [vmem:[%s161_s3] sm:$0xff] %v188_v13 }
  0xde   : > { %v189_v16 = vmul.f32 %v288_v11, %v180_v15 }
  0xe0   : > { %191 = vst [vmem:[%s161_s3 + $0x8] sm:$0xff] %v189_v16 }
  0xe1   : > { %393 = shalt.err (!%p390_p2)
}
  0xe2   : > { %s394_s24 = scalar_lea.hbm %s588_s14, 256  ;;  %s398_s29 = scalar_lea.hbm %s636_s2, 512 }
  0xe3   : > { %p395_p4 = scmp.ne.s32.totalorder %s588_s14, %s394_s24  ;;  %p399_p9 = scmp.lt.u32.totalorder %s588_s14, %s636_s2 }
  0xe4   : > { %p400_p1 = scmp.lt.u32.totalorder %s398_s29, %s394_s24  ;;  %p402_p6 = scmp.lt.u32.totalorder %s394_s24, %s588_s14 }
  0xe5   : > { %p396_p5 = pnand %p395_p4, %p643_p11 }
  0xe6   : > { %p401_p3 = por %p400_p1, %p399_p9 }
  0xe7   : > { %p397_p7 = pneg %p396_p5 }
  0xe8   : > { %p403_p12 = por %p402_p6, %p401_p3 }
  0xea   : > { %p404_p13 = pnand %p403_p12, %p397_p7 }
  0xec   : > { %407 = shalt.err (!%p404_p13)
}
  0xed   : > { %s452_s28 = smov 128   ;;  %s453_s20 = smov 8  }
  0xee   : > { %298 = dma.vmem_to_hbm [thread:$0]  (%p643_p11), %s590_s4, 256, %s588_s14, %s193_s16, %s452_s28, %s452_s28, %s453_s20  }
  0xef PF: > { %s221_s30 = sand.u32 1, %s434_s9   ;;  %p644_p8 = scmp.ne.s32.totalorder %s641_s22, 0 }
  0xf0   : > { %p645_p10 = scmp.ge.s32.totalorder %s446_s12, 2  ;;  %s222_s3 = scalar_lea.sflag [#allocation4], %s221_s30 }
  0xf2   : > { %p305_p0 = pnand %p645_p10, %p644_p8 }
  0xf4   : > { %429 = dma.done.wait (!%p305_p0), %s222_s3, 256  }
  0xf5   : > { %431 = vsyncadd (!%p305_p0), %s222_s3, 4294967040  ;;  %p15_p2 = scmp.ge.s32.totalorder %s494_s15, 4   ;;  %s646_s9 = smov %s438_s10 }
  0xf6   : > { %s647_s10 = smov %s442_s11  ;;  %s648_s11 = smov %s506_s18 }
  0xf7   : > { %s649_s12 = smov %s494_s15  ;;  %17 = sbr.rel (!%p15_p2) target bundleno = 5 (0x5), region = 73 }
  0xfe   :  { %227 = vsyncpa [#allocation3], 1 }
  0xff   :  { %229 = vsyncpa [#allocation3 + $0x1], 1 }
 0x100   :  { %230 = vsyncpa [#allocation4], 1 }
 0x101   :  { %232 = vsyncpa [#allocation4 + $0x1], 1 }

</bundles_post_ra>
